<compile_context>
chip_gen: v7x
topology: tpu7x:2x2x1
jax: 0.10.0
libtpu: 0.0.40
codegen_flags: <defaults>
</compile_context>

<pallas_src>
import jax
import jax.numpy as jnp
import numpy as np
from jax.experimental import pallas as pl
from jax.experimental.pallas import tpu as pltpu

NUM_FREQ = 8
IN_DIM = 3
SC_DIM = IN_DIM * NUM_FREQ               # 24 sin cols / 24 cos cols
FEAT_DIM = IN_DIM + 2 * SC_DIM           # 51


def _round_up(x, m):
    return ((x + m - 1) // m) * m


def _fourier_encoder_kernel(pts_ref, scale_ref, w_id_ref, w_sin_ref, w_cos_ref,
                            b_ref, out_ref):
    # pts_ref:   (tm, 3)
    # scale_ref: (3, 24)   S[i, i*8+k] = 2**k
    # w_id_ref:  (3, tn)   rows 0:3   of W^T (hidden padded to tn multiple)
    # w_sin_ref: (24, tn)  rows 3:27  of W^T
    # w_cos_ref: (24, tn)  rows 27:51 of W^T
    # b_ref:     (1, tn)
    # out_ref:   (tm, tn)
    pts = pts_ref[...]                                                     # (tm, 3)

    # Coord-major, frequency-minor scaled coords via a tiny MXU matmul
    # (no lane shuffles / gathers).
    xf = jnp.dot(pts, scale_ref[...], preferred_element_type=jnp.float32)  # (tm, 24)

    acc = jnp.dot(pts, w_id_ref[...], preferred_element_type=jnp.float32)
    acc = acc + jnp.dot(jnp.sin(xf), w_sin_ref[...],
                        preferred_element_type=jnp.float32)
    acc = acc + jnp.dot(jnp.cos(xf), w_cos_ref[...],
                        preferred_element_type=jnp.float32)
    out_ref[...] = (acc + b_ref[...]).astype(out_ref.dtype)


def fourier_point_encoder(points, weight, bias, *, tm=1024, tn=512):
    """points: (B, N, 3) f32; weight: (hidden, 51) f32 (PyTorch Linear layout); bias: (hidden,)."""
    B, N, _ = points.shape
    hidden = weight.shape[0]
    M = B * N

    # --- Row tiling: large tile, but no bigger than the (8-aligned) row count. ---
    tm = min(tm, _round_up(M, 8))
    M_pad = _round_up(M, tm)

    # --- Hidden tiling: lane-dense (multiple of 128); tile at <= tn if hidden is big. ---
    Hp = _round_up(hidden, 128)
    if Hp <= tn:
        tn = Hp
    else:
        tn = _round_up(min(tn, Hp), 128)
        Hp = _round_up(hidden, tn)

    pts_flat = points.reshape(M, IN_DIM).astype(jnp.float32)
    if M_pad != M:
        pts_flat = jnp.pad(pts_flat, ((0, M_pad - M), (0, 0)))

    w = weight.astype(jnp.float32)                     # (hidden, 51)
    if Hp != hidden:
        w = jnp.pad(w, ((0, Hp - hidden), (0, 0)))     # zero columns in W^T
    w_t = w.T                                          # (51, Hp)
    w_id = w_t[:IN_DIM]                                # (3, Hp)
    w_sin = w_t[IN_DIM:IN_DIM + SC_DIM]                # (24, Hp)
    w_cos = w_t[IN_DIM + SC_DIM:FEAT_DIM]              # (24, Hp)

    b = bias.astype(jnp.float32)
    if Hp != hidden:
        b = jnp.pad(b, (0, Hp - hidden))
    b2d = b.reshape(1, Hp)

    # Constant frequency-scale matrix, passed as an input (no captured constants).
    scale_np = np.zeros((IN_DIM, SC_DIM), dtype=np.float32)
    for i in range(IN_DIM):
        scale_np[i, i * NUM_FREQ:(i + 1) * NUM_FREQ] = 2.0 ** np.arange(
            NUM_FREQ, dtype=np.float32)
    scale = jnp.asarray(scale_np)

    grid = (M_pad // tm, Hp // tn)

    out = pl.pallas_call(
        _fourier_encoder_kernel,
        out_shape=jax.ShapeDtypeStruct((M_pad, Hp), jnp.float32),
        grid_spec=pltpu.PrefetchScalarGridSpec(
            num_scalar_prefetch=0,
            grid=grid,
            in_specs=[
                pl.BlockSpec((tm, IN_DIM), lambda i, j: (i, 0)),
                pl.BlockSpec((IN_DIM, SC_DIM), lambda i, j: (0, 0)),
                pl.BlockSpec((IN_DIM, tn), lambda i, j: (0, j)),
                pl.BlockSpec((SC_DIM, tn), lambda i, j: (0, j)),
                pl.BlockSpec((SC_DIM, tn), lambda i, j: (0, j)),
                pl.BlockSpec((1, tn), lambda i, j: (0, j)),
            ],
            out_specs=pl.BlockSpec((tm, tn), lambda i, j: (i, j)),
        ),
        compiler_params=pltpu.CompilerParams(
            dimension_semantics=("parallel", "parallel"),
        ),
    )(pts_flat, scale, w_id, w_sin, w_cos, b2d)

    return out[:M, :hidden].reshape(B, N, hidden)


def _reference(points, weight, bias):
    # Pure-JAX reference mirroring the PyTorch forward.
    freqs = 2.0 ** jnp.arange(NUM_FREQ, dtype=jnp.float32)
    x = (points[..., None] * freqs).reshape(*points.shape[:-1], -1)  # (..., 24)
    x = jnp.concatenate([points, jnp.sin(x), jnp.cos(x)], axis=-1)   # (..., 51)
    return x @ weight.T + bias


if __name__ == "__main__":
    key = jax.random.PRNGKey(0)
    k_pts, k_w, k_b = jax.random.split(key, 3)

    B, N, hidden = 2, 8, 32  # small shapes consistent with the module
    points = jax.random.normal(k_pts, (B, N, IN_DIM), dtype=jnp.float32)

    # Deterministic synthetic parameters (PyTorch Linear shapes: W (hidden, 51), b (hidden,)).
    bound = 1.0 / np.sqrt(FEAT_DIM)
    weight = jax.random.uniform(k_w, (hidden, FEAT_DIM), jnp.float32, -bound, bound)
    bias = jax.random.uniform(k_b, (hidden,), jnp.float32, -bound, bound)

    out = fourier_point_encoder(points, weight, bias)
    out = jax.block_until_ready(out)

    ref = _reference(points, weight, bias)
    np.testing.assert_allclose(np.asarray(out), np.asarray(ref), rtol=1e-5, atol=1e-5)

    print("KERNEL_OK")
</pallas_src>

<mosaic_0001>
module attributes {stable_mosaic.version = 11 : i64} {
  func.func @_fourier_encoder_kernel(%arg0: i32, %arg1: i32, %arg2: memref<16x3xf32, #tpu.memory_space<vmem>>, %arg3: memref<3x24xf32, #tpu.memory_space<vmem>>, %arg4: memref<3x128xf32, #tpu.memory_space<vmem>>, %arg5: memref<24x128xf32, #tpu.memory_space<vmem>>, %arg6: memref<24x128xf32, #tpu.memory_space<vmem>>, %arg7: memref<1x128xf32, #tpu.memory_space<vmem>>, %arg8: memref<16x128xf32, #tpu.memory_space<vmem>>) attributes {dimension_semantics = [#tpu.dimension_semantics<parallel>, #tpu.dimension_semantics<parallel>], iteration_bounds = array<i64: 1, 1>, scalar_prefetch = 0 : i64, scratch_operands = 0 : i64, tpu.core_type = #tpu.core_type<tc>, window_params = [{transform_indices = @transform_0, window_bounds = array<i64: 16, 3>}, {pipeline_mode = #tpu.pipeline_mode<synchronous>, transform_indices = @transform_1, window_bounds = array<i64: 3, 24>}, {transform_indices = @transform_2, window_bounds = array<i64: 3, 128>}, {transform_indices = @transform_3, window_bounds = array<i64: 24, 128>}, {transform_indices = @transform_4, window_bounds = array<i64: 24, 128>}, {transform_indices = @transform_5, window_bounds = array<i64: 1, 128>}, {transform_indices = @transform_6, window_bounds = array<i64: 16, 128>}]} {
    %c0 = arith.constant 0 : index
    %c0_0 = arith.constant 0 : index
    %0 = vector.load %arg2[%c0, %c0_0] : memref<16x3xf32, #tpu.memory_space<vmem>>, vector<16x3xf32>
    %c0_1 = arith.constant 0 : index
    %c0_2 = arith.constant 0 : index
    %1 = vector.load %arg3[%c0_1, %c0_2] : memref<3x24xf32, #tpu.memory_space<vmem>>, vector<3x24xf32>
    %cst = arith.constant dense<0.000000e+00> : vector<16x24xf32>
    %2 = tpu.matmul %0, %1, %cst {dimension_numbers = #tpu.dot_dimension_numbers<[1], [0], [0], [1], [0, 0, 1, 1], [], []>} : vector<16x3xf32>, vector<3x24xf32>, vector<16x24xf32> -> vector<16x24xf32>
    %c0_3 = arith.constant 0 : index
    %c0_4 = arith.constant 0 : index
    %3 = vector.load %arg4[%c0_3, %c0_4] : memref<3x128xf32, #tpu.memory_space<vmem>>, vector<3x128xf32>
    %cst_5 = arith.constant dense<0.000000e+00> : vector<16x128xf32>
    %4 = tpu.matmul %0, %3, %cst_5 {dimension_numbers = #tpu.dot_dimension_numbers<[1], [0], [0], [1], [0, 0, 1, 1], [], []>} : vector<16x3xf32>, vector<3x128xf32>, vector<16x128xf32> -> vector<16x128xf32>
    %5 = math.sin %2 : vector<16x24xf32>
    %c0_6 = arith.constant 0 : index
    %c0_7 = arith.constant 0 : index
    %6 = vector.load %arg5[%c0_6, %c0_7] : memref<24x128xf32, #tpu.memory_space<vmem>>, vector<24x128xf32>
    %cst_8 = arith.constant dense<0.000000e+00> : vector<16x128xf32>
    %7 = tpu.matmul %5, %6, %cst_8 {dimension_numbers = #tpu.dot_dimension_numbers<[1], [0], [0], [1], [0, 0, 1, 1], [], []>} : vector<16x24xf32>, vector<24x128xf32>, vector<16x128xf32> -> vector<16x128xf32>
    %8 = arith.addf %4, %7 : vector<16x128xf32>
    %9 = math.cos %2 : vector<16x24xf32>
    %c0_9 = arith.constant 0 : index
    %c0_10 = arith.constant 0 : index
    %10 = vector.load %arg6[%c0_9, %c0_10] : memref<24x128xf32, #tpu.memory_space<vmem>>, vector<24x128xf32>
    %cst_11 = arith.constant dense<0.000000e+00> : vector<16x128xf32>
    %11 = tpu.matmul %9, %10, %cst_11 {dimension_numbers = #tpu.dot_dimension_numbers<[1], [0], [0], [1], [0, 0, 1, 1], [], []>} : vector<16x24xf32>, vector<24x128xf32>, vector<16x128xf32> -> vector<16x128xf32>
    %12 = arith.addf %8, %11 : vector<16x128xf32>
    %c0_12 = arith.constant 0 : index
    %c0_13 = arith.constant 0 : index
    %13 = vector.load %arg7[%c0_12, %c0_13] : memref<1x128xf32, #tpu.memory_space<vmem>>, vector<1x128xf32>
    %14 = vector.broadcast %13 : vector<1x128xf32> to vector<16x128xf32>
    %15 = arith.addf %12, %14 : vector<16x128xf32>
    %c0_14 = arith.constant 0 : index
    %c0_15 = arith.constant 0 : index
    %16 = vector.load %arg8[%c0_14, %c0_15] : memref<16x128xf32, #tpu.memory_space<vmem>>, vector<16x128xf32>
    tpu.vector_store %arg8[%c0_14, %c0_15], %15 {strides = array<i32>} : memref<16x128xf32, #tpu.memory_space<vmem>>, vector<16x128xf32>,
    return
  }
  func.func @transform_0(%arg0: i32, %arg1: i32) -> (i32, i32) {
    %c0_i32 = arith.constant 0 : i32
    %c0_i32_0 = arith.constant 0 : i32
    return %arg0, %c0_i32 : i32, i32
  }
  func.func @transform_1(%arg0: i32, %arg1: i32) -> (i32, i32) {
    %c0_i32 = arith.constant 0 : i32
    %c0_i32_0 = arith.constant 0 : i32
    %c0_i32_1 = arith.constant 0 : i32
    return %c0_i32, %c0_i32_0 : i32, i32
  }
  func.func @transform_2(%arg0: i32, %arg1: i32) -> (i32, i32) {
    %c0_i32 = arith.constant 0 : i32
    %c0_i32_0 = arith.constant 0 : i32
    return %c0_i32, %arg1 : i32, i32
  }
  func.func @transform_3(%arg0: i32, %arg1: i32) -> (i32, i32) {
    %c0_i32 = arith.constant 0 : i32
    %c0_i32_0 = arith.constant 0 : i32
    return %c0_i32, %arg1 : i32, i32
  }
  func.func @transform_4(%arg0: i32, %arg1: i32) -> (i32, i32) {
    %c0_i32 = arith.constant 0 : i32
    %c0_i32_0 = arith.constant 0 : i32
    return %c0_i32, %arg1 : i32, i32
  }
  func.func @transform_5(%arg0: i32, %arg1: i32) -> (i32, i32) {
    %c0_i32 = arith.constant 0 : i32
    %c0_i32_0 = arith.constant 0 : i32
    return %c0_i32, %arg1 : i32, i32
  }
  func.func @transform_6(%arg0: i32, %arg1: i32) -> (i32, i32) {
    %c0_i32 = arith.constant 0 : i32
    return %arg0, %arg1 : i32, i32
  }
}

</mosaic_0001>

<bundles_post_ra>
// kernel: tpu_custom_call.1
= control target key start
LH: loop header
LB: loop body
LE: loop exit
PB: predicated region body
PF: predicated region fallthrough
CT: control target
= control target key end

     0   :  { %11 = vsyncpa [#allocation3], 0  ;;  %s1207_s0 = inlined_call_operand.vmem [shape: f32[16,3], index: 0, kind: input, shape index: {}]   ;;  %s1208_s1 = inlined_call_operand.vmem [shape: f32[3,24], index: 1, kind: input, shape index: {}]   ;;  %s1209_s2 = inlined_call_operand.hbm [shape: f32[3,128], index: 2, kind: input, shape index: {}]   ;;  %s1210_s3 = inlined_call_operand.vmem [shape: f32[24,128], index: 3, kind: input, shape index: {}]   ;;  %s1211_s4 = inlined_call_operand.hbm [shape: f32[24,128], index: 4, kind: input, shape index: {}]   ;;  %s1212_s5 = inlined_call_operand.vmem [shape: f32[1,128], index: 5, kind: input, shape index: {}]   ;;  %s1213_s6 = inlined_call_operand.hbm [shape: f32[16,128], index: 6, kind: output, shape index: {}]  }
   0x1   :  { %12 = vsyncpa [#allocation6], 0 }
   0x2   :  { %13 = vsyncpa [#allocation4], 0  ;;  %s1014_s21 = smov [#allocation2]   ;;  %s1015_s23 = smov [#allocation5]  }
   0x3   :  { %s24_s22 = sshll.u32 %s1014_s21, 4  ;;  %s35_s24 = sshll.u32 %s1015_s23, 4  ;;  %s25_s22 = int_to_ptr.vmem [resolvable:$true] %s24_s22  ;;  %s1060_s24 = int_to_ptr.vmem [resolvable:$true] %s35_s24 }
   0x4   :  { %s942_s27 = scalar_lea.hbm %s1209_s2, 64 }
   0x5   :  { %p943_p0 = scmp.ne.s32.totalorder %s1209_s2, %s942_s27  ;;  %p946_p1 = scmp.lt.u32.totalorder %s942_s27, %s1209_s2 }
   0x7   :  { %p948_p2 = pnand %p946_p1, %p943_p0 }
   0x9   :  { %951 = shalt.err (!%p948_p2)
}
   0xa   :  { %s952_s8 = scalar_lea.vmem %s25_s22, 64  ;;  %p957_p4 = scmp.lt.s32.totalorder %s25_s22, %s25_s22 }
   0xb   :  { %p953_p3 = scmp.ne.s32.totalorder %s25_s22, %s952_s8  ;;  %p958_p5 = scmp.lt.s32.totalorder %s952_s8, %s952_s8 }
   0xd   :  { %p959_p6 = por %p958_p5, %p957_p4 }
   0xf   :  { %p960_p7 = pnand %p959_p6, %p953_p3 }
  0x11   :  { %963 = shalt.err (!%p960_p7)
}
  0x12   :  { %27 = dma.hbm_to_vmem [thread:$0]  %s1209_s2, 64, %s25_s22, [#allocation3]  }
  0x13   :  { %s964_s13 = scalar_lea.hbm %s1211_s4, 384 }
  0x14   :  { %p965_p8 = scmp.ne.s32.totalorder %s1211_s4, %s964_s13  ;;  %p968_p9 = scmp.lt.u32.totalorder %s964_s13, %s1211_s4 }
  0x16   :  { %p970_p10 = pnand %p968_p9, %p965_p8 }
  0x18   :  { %973 = shalt.err (!%p970_p10)
}
  0x19   :  { %s974_s18 = scalar_lea.vmem %s1060_s24, 384  ;;  %p979_p12 = scmp.lt.s32.totalorder %s1060_s24, %s1060_s24 }
  0x1a   :  { %p975_p11 = scmp.ne.s32.totalorder %s1060_s24, %s974_s18  ;;  %p980_p13 = scmp.lt.s32.totalorder %s974_s18, %s974_s18 }
  0x1c   :  { %p981_p0 = por %p980_p13, %p979_p12 }
  0x1e   :  { %p982_p1 = pnand %p981_p0, %p975_p11 }
  0x20   :  { %985 = shalt.err (!%p982_p1)
}
  0x21   :  { %s1016_s2 = smov 128   ;;  %s1017_s19 = smov 8  }
  0x22   :  { %41 = dma.hbm_to_vmem [thread:$0]  %s1211_s4, 384, %s1060_s24, [#allocation6], %s1016_s2, %s1016_s2, %s1017_s19  }
  0x23   :  { %1008 = dma.done.wait [#allocation3], 64  }
  0x24   :  { %1009 = vsyncadd [#allocation3], 4294967232 }
  0x25   :  { %1010 = dma.done.wait [#allocation6], 384  }
  0x26   :  { %1011 = vsyncadd [#allocation6], 4294966912  ;;  %vm60_vm0 = vcmask 1042432   ;;  %vm53_vm1 = vcmask 23552   ;;  %v52_v0 = vld [vmem:[%s1208_s1] sm:$0x7] }
  0x27   :  { %v50_v1 = vld [vmem:[%s1207_s0] sm:$0xff]  ;;  %v51_v2 = vld [vmem:[%s1207_s0 + $0x8] sm:$0xff]  ;;  %875 = vmatprep.subr.msk.mxu0 %vm60_vm0, %v52_v0  ;;  %v139_v3 = vld [vmem:[#allocation2] sm:$0x7]  ;;  %v1018_v34 = vmov 683565275  }
  0x28   :  { %877 = vmatprep.mubr.msk.f32.mxu0 %vm53_vm1, %v50_v1  ;;  %876 = vmatpush3.msk.msra.mxu0 %vm60_vm0, %v52_v0  ;;  %v717_v4 = vld [vmem:[#allocation5] sm:$0xff]  ;;  %v718_v5 = vld [vmem:[#allocation5 + $0x8] sm:$0xff]  ;;  %v719_v10 = vld [vmem:[#allocation5 + $0x10] sm:$0xff]  ;;  %v1019_v38 = vmov 2475754826   ;;  %s1024_s8 = smov [#allocation7]  }
  0x29   :  { %891 = vmatprep.mubr.msk.f32.mxu1 %vm53_vm1, %v50_v1  ;;  %878 = vmatmul.mubr.msk.f32.vlgmr.msra.gmra.mrb[0].mxu0 %vm53_vm1, %v51_v2  ;;  %v907_v6 = vpack.c.bf16 %v718_v5, %v717_v4  ;;  %v348_v7 = vld [vmem:[%s1210_s3] sm:$0xff]  ;;  %v349_v8 = vld [vmem:[%s1210_s3 + $0x8] sm:$0xff]  ;;  %v350_v11 = vld [vmem:[%s1210_s3 + $0x10] sm:$0xff]  ;;  %v1020_v40 = vmov 2131351028   ;;  %s819_s9 = sshll.u32 %s1024_s8, 4  ;;  %s820_s9 = int_to_ptr.vmem [resolvable:$true] %s819_s9 }
  0x2a   :  { %889 = vmatprep.subr.msk.mxu1 %vm60_vm0, %v139_v3  ;;  %v903_v9 = vpack.c.bf16 %v349_v8, %v348_v7  ;;  %v1021_v42 = vmov 2102212464   ;;  %v1022_v44 = vmov 920167782   ;;  %v1023_v51 = vmov 1326507024   ;;  %p991_p3 = scmp.lt.s32.totalorder %s820_s9, %s820_s9 }
  0x2b   :  { %890 = vmatpush3.msk.msra.mxu1 %vm60_vm0, %v139_v3  ;;  %s986_s10 = scalar_lea.vmem %s820_s9, 256 }
  0x2c   :  { %908 = vmatprep.subr.bf16.mxu1 %v907_v6  ;;  %892 = vmatmul.mubr.msk.f32.vlgmr.msra.gmra.mrb[0].mxu1 %vm53_vm1, %v51_v2  ;;  %p987_p2 = scmp.ne.s32.totalorder %s820_s9, %s986_s10  ;;  %p992_p4 = scmp.lt.s32.totalorder %s986_s10, %s986_s10 }
  0x2d   :  { %910 = vmatpush3.bf16.msra.mxu1 %v907_v6  ;;  %904 = vmatprep.subr.bf16.mxu0 %v903_v9 }
  0x2e   :  { %906 = vmatpush3.bf16.msra.mxu0 %v903_v9  ;;  %898 = vmatprep.subr.mxu1 %v719_v10  ;;  %p993_p5 = por %p992_p4, %p991_p3 }
  0x2f   :  { %884 = vmatprep.subr.mxu0 %v350_v11 }
  0x30   :  { %p994_p6 = pnand %p993_p5, %p987_p2 }
  0x31   :  { %899 = vmatpush3.msra.mxu1 %v719_v10 }
  0x32   :  { %885 = vmatpush3.msra.mxu0 %v350_v11 }
  0xfc   :  { %v1120_v12 = vpop.f32.mrb[0].mxu0 }
  0xfd   :  { %v244_v13 = vand.u32 2147483647, %v1120_v12  ;;  %v247_v14 = vand.u32 2139095040, %v1120_v12  ;;  %v1124_v15 = vpop.f32.mrb[1].mxu0  ;;  %vm246_vm0 = vcmp.lt.s32.totalorder %v1120_v12, 0 }
  0xfe   :  { %v143_v16 = vand.u32 2139095040, %v1124_v15  ;;  %v140_v19 = vand.u32 2147483647, %v1124_v15 }
  0xff   :  { %v248_v17 = vshrl.u32 %v247_v14, 23  ;;  %v251_v18 = vand.u32 8388607, %v244_v13  ;;  %vm245_vm1 = vcmp.le.f32.partialorder %v244_v13, 0.7853982 }
 0x100   :  { %v144_v20 = vshrl.u32 %v143_v16, 23  ;;  %v1132_v25 = vand.u32 8388607, %v140_v19 }
 0x101   :  { %v839_v21 = vadd.s32 4294967169, %v248_v17  ;;  %v252_v24 = vor.u32 8388608, %v251_v18 }
 0x102   :  { %v835_v22 = vadd.s32 4294967169, %v144_v20  ;;  %v148_v32 = vor.u32 8388608, %v1132_v25 }
 0x103   :  { %v254_v23 = vadd.s32 1, %v839_v21  ;;  %v1134_v31 = vshll.u32 %v252_v24, 8 }
 0x104   :  { %v150_v26 = vadd.s32 1, %v835_v22 }
 0x105   :  { %vm255_vm2 = vcmp.gt.s32.totalorder %v254_v23, 0 }
 0x106   :  { %v256_v27 = vsel %vm255_vm2, %v254_v23, 0  ;;  %vm151_vm3 = vcmp.gt.s32.totalorder %v150_v26, 0  ;;  %vm142_vm2 = vcmp.lt.s32.totalorder %v1124_v15, 0 }
 0x107   :  { %v257_v28 = vshrl.u32 %v256_v27, 5  ;;  %v258_v29 = vand.u32 31, %v256_v27  ;;  %v152_v30 = vsel %vm151_vm3, %v150_v26, 0  ;;  %v188_v26 = vshll.u32 %v148_v32, 8 }
 0x108   :  { %v1137_v36 = vshrl.u32 %v152_v30, 5  ;;  %v154_v37 = vand.u32 31, %v152_v30  ;;  %vm141_vm3 = vcmp.le.f32.partialorder %v140_v19, 0.7853982 }
 0x109   :  { %v259_v33 = vsub.s32 32, %v258_v29  ;;  %v261_v35 = vshll.u32 %v1018_v34, %v258_v29  ;;  %v264_v39 = vshll.u32 %v1019_v38, %v258_v29  ;;  %v267_v41 = vshll.u32 %v1020_v40, %v258_v29 }
 0x10a   :  { %v270_v43 = vshll.u32 %v1021_v42, %v258_v29  ;;  %v273_v45 = vshll.u32 %v1022_v44, %v258_v29  ;;  %vm276_vm4 = vcmp.lt.s32.totalorder %v257_v28, 1  ;;  %vm277_vm5 = vcmp.lt.s32.totalorder %v257_v28, 2 }
 0x10b   :  { %v262_v46 = vshrl.u32 %v1019_v38, %v259_v33  ;;  %v265_v47 = vshrl.u32 %v1020_v40, %v259_v33  ;;  %v268_v48 = vshrl.u32 %v1021_v42, %v259_v33  ;;  %v260_v49 = vshrl.u32 %v1018_v34, %v259_v33 }
 0x10c   :  { %v271_v50 = vshrl.u32 %v1022_v44, %v259_v33  ;;  %v274_v52 = vshrl.u32 %v1023_v51, %v259_v33  ;;  %v155_v56 = vsub.s32 32, %v154_v37  ;;  %vm278_vm6 = vcmp.lt.s32.totalorder %v257_v28, 3 }
 0x10d   :  { %v263_v53 = vor.u32 %v262_v46, %v261_v35  ;;  %v266_v54 = vor.u32 %v265_v47, %v264_v39  ;;  %v269_v55 = vor.u32 %v268_v48, %v267_v41  ;;  %vm279_vm7 = vcmp.lt.s32.totalorder %v257_v28, 4 }
 0x10e   :  { %v272_v57 = vor.u32 %v271_v50, %v270_v43  ;;  %v275_v58 = vor.u32 %v274_v52, %v273_v45  ;;  %v157_v2 = vshll.u32 %v1018_v34, %v154_v37  ;;  %v158_v5 = vshrl.u32 %v1019_v38, %v155_v56 }
 0x10f   :  { %v280_v59 = vsel %vm276_vm4, %v260_v49, %v263_v53  ;;  %v281_v60 = vsel %vm279_vm7, %v269_v55, 2102212464  ;;  %v284_v61 = vsel %vm276_vm4, %v263_v53, %v266_v54  ;;  %v288_v62 = vsel %vm276_vm4, %v266_v54, %v269_v55 }
 0x110   :  { %v282_v63 = vsel %vm278_vm6, %v266_v54, %v281_v60  ;;  %v285_v0 = vsel %vm279_vm7, %v272_v57, 920167782  ;;  %v289_v1 = vsel %vm279_vm7, %v275_v58, 1326507024  ;;  %v160_v6 = vshll.u32 %v1019_v38, %v154_v37 }
 0x111   :  { %v286_v3 = vsel %vm278_vm6, %v269_v55, %v285_v0  ;;  %v290_v4 = vsel %vm278_vm6, %v272_v57, %v289_v1  ;;  %v283_v7 = vsel %vm277_vm5, %v280_v59, %v282_v63  ;;  %v161_v10 = vshrl.u32 %v1020_v40, %v155_v56 }
 0x112   :  { %v287_v8 = vsel %vm277_vm5, %v284_v61, %v286_v3  ;;  %v291_v9 = vsel %vm277_vm5, %v288_v62, %v290_v4  ;;  %v159_v18 = vor.u32 %v158_v5, %v157_v2  ;;  %v163_v21 = vshll.u32 %v1020_v40, %v154_v37 }
 0x113   :  { %v1146_v11 = vmul.u32.u64.low %v1134_v31, %v291_v9  ;;  %v1147_v14 = vmul.u32.u64.high %v1134_v31, %v291_v9, %v1146_v11  ;;  %v1150_v16 = vmul.u32.u64.low %v1134_v31, %v287_v8  ;;  %v1151_v17 = vmul.u32.u64.high %v1134_v31, %v287_v8, %v1150_v16 }
 0x114   :  { %v162_v20 = vor.u32 %v161_v10, %v160_v6  ;;  %v164_v22 = vshrl.u32 %v1021_v42, %v155_v56  ;;  %v166_v23 = vshll.u32 %v1021_v42, %v154_v37  ;;  %v167_v24 = vshrl.u32 %v1022_v44, %v155_v56 }
 0x115   :  { %v170_v25 = vshrl.u32 %v1023_v51, %v155_v56  ;;  %v299_v27 = vmul.u32 %v1134_v31, %v283_v7  ;;  %v156_v28 = vshrl.u32 %v1018_v34, %v155_v56  ;;  %v169_v30 = vshll.u32 %v1022_v44, %v154_v37 }
 0x116   :  { %v165_v29 = vor.u32 %v164_v22, %v163_v21  ;;  %vm301_vm8 = vc.u32 %v1147_v14, %v1150_v16  ;;  %v302_v33 = vadd.s32 1, %v1151_v17  ;;  %v168_v35 = vor.u32 %v167_v24, %v166_v23 }
 0x117   :  { %vm172_vm9 = vcmp.lt.s32.totalorder %v1137_v36, 1  ;;  %v171_v38 = vor.u32 %v170_v25, %v169_v30  ;;  %vm174_vm10 = vcmp.lt.s32.totalorder %v1137_v36, 3  ;;  %vm175_vm11 = vcmp.lt.s32.totalorder %v1137_v36, 4 }
 0x118   :  { %v180_v39 = vsel %vm172_vm9, %v159_v18, %v162_v20  ;;  %v303_v32 = vsel %vm301_vm8, %v302_v33, %v1151_v17  ;;  %v177_v40 = vsel %vm175_vm11, %v165_v29, 2102212464  ;;  %v181_v31 = vsel %vm175_vm11, %v168_v35, 920167782 }
 0x119   :  { %v184_v34 = vsel %vm172_vm9, %v162_v20, %v165_v29  ;;  %v304_v41 = vadd.s32 %v303_v32, %v299_v27  ;;  %vm173_vm12 = vcmp.lt.s32.totalorder %v1137_v36, 2  ;;  %v182_v37 = vsel %vm174_vm10, %v165_v29, %v181_v31 }
 0x11a   :  { %v185_v42 = vsel %vm175_vm11, %v171_v38, 1326507024  ;;  %v176_v43 = vsel %vm172_vm9, %v156_v28, %v159_v18  ;;  %v178_v44 = vsel %vm174_vm10, %v162_v20, %v177_v40  ;;  %v183_v45 = vsel %vm173_vm12, %v180_v39, %v182_v37 }
 0x11b   :  { %v186_v46 = vsel %vm174_vm10, %v168_v35, %v185_v42  ;;  %v305_v47 = vadd.s32 536870912, %v304_v41  ;;  %v1161_v49 = vmul.u32.u64.low %v188_v26, %v183_v45  ;;  %v1162_v50 = vmul.u32.u64.high %v188_v26, %v183_v45, %v1161_v49 }
 0x11c   :  { %v187_v48 = vsel %vm173_vm12, %v184_v34, %v186_v46  ;;  %v179_v54 = vsel %vm173_vm12, %v176_v43, %v178_v44  ;;  %v300_v6 = vadd.s32 %v1150_v16, %v1147_v14  ;;  %vm351_vm4 = vcmask 195584  }
 0x11d   :  { %v1164_v51 = vmul.u32.u64.low %v188_v26, %v187_v48  ;;  %v1165_v52 = vmul.u32.u64.high %v188_v26, %v187_v48, %v1164_v51  ;;  %v306_v53 = vshrl.u32 %v305_v47, 30  ;;  %v198_v56 = vadd.s32 1, %v1162_v50 }
 0x11e   :  { %v195_v36 = vmul.u32 %v188_v26, %v179_v54 }
 0x11f   :  { %v307_v55 = vshll.u32 %v306_v53, 30  ;;  %vm197_vm13 = vc.u32 %v1165_v52, %v1161_v49  ;;  %v196_v27 = vadd.s32 %v1161_v49, %v1165_v52  ;;  %v330_v34 = vsub.s32 4, %v306_v53 }
 0x120   :  { %v199_v58 = vsel %vm197_vm13, %v198_v56, %v1162_v50 }
 0x121   :  { %v308_v57 = vsub.s32 %v304_v41, %v307_v55  ;;  %v200_v59 = vadd.s32 %v199_v58, %v195_v36  ;;  %v331_v44 = vsel %vm246_vm0, %v330_v34, %v306_v53 }
 0x122   :  { %v333_v46 = vsel %vm245_vm1, 0, %v331_v44 }
 0x123   :  { %v310_v60 = vsub.s32 0, %v308_v57  ;;  %v201_v61 = vadd.s32 536870912, %v200_v59  ;;  %v337_v49 = vadd.s32 3, %v333_v46  ;;  %v707_v53 = vand.u32 3, %v333_v46 }
 0x125   :  { %v840_v62 = vmin.u32 %v310_v60, %v308_v57  ;;  %v202_v63 = vshrl.u32 %v201_v61, 30  ;;  %v338_v55 = vand.u32 3, %v337_v49  ;;  %vm708_vm6 = vcmp.lt.s32.totalorder %v707_v53, 2 }
 0x126   :  { %vm709_vm7 = vcmp.eq.s32.totalorder %v707_v53, 0  ;;  %vm712_vm8 = vcmp.eq.s32.totalorder %v707_v53, 2 }
 0x127   :  { %v312_v0 = vclz %v840_v62  ;;  %v203_v1 = vshll.u32 %v202_v63, 30  ;;  %v226_v43 = vsub.s32 4, %v202_v63  ;;  %vm343_vm5 = vcmp.eq.s32.totalorder %v338_v55, 2 }
 0x128   :  { %vm339_vm10 = vcmp.lt.s32.totalorder %v338_v55, 2  ;;  %vm340_vm11 = vcmp.eq.s32.totalorder %v338_v55, 0 }
 0x129   :  { %v841_v2 = vadd.s32 4294967294, %v312_v0  ;;  %v204_v3 = vsub.s32 %v200_v59, %v203_v1  ;;  %v227_v47 = vsel %vm142_vm2, %v226_v43, %v202_v63 }
 0x12a   :  { %v229_v50 = vsel %vm141_vm3, 0, %v227_v47 }
 0x12b   :  { %vm842_vm14 = vcmp.lt.s32.totalorder %v841_v2, 0  ;;  %v206_v5 = vsub.s32 0, %v204_v3  ;;  %v233_v54 = vadd.s32 3, %v229_v50  ;;  %v604_v56 = vand.u32 3, %v229_v50 }
 0x12c   :  { %v315_v4 = vsel %vm842_vm14, 0, %v841_v2 }
 0x12d   :  { %v316_v7 = vsub.s32 32, %v315_v4  ;;  %v320_v8 = vsub.s32 4294967266, %v315_v4  ;;  %v836_v9 = vmin.u32 %v206_v5, %v204_v3  ;;  %v317_v10 = vshll.u32 %v308_v57, %v315_v4 }
 0x12e   :  { %v234_v58 = vand.u32 3, %v233_v54  ;;  %vm605_vm9 = vcmp.lt.s32.totalorder %v604_v56, 2  ;;  %vm606_vm13 = vcmp.eq.s32.totalorder %v604_v56, 0  ;;  %vm609_vm14 = vcmp.eq.s32.totalorder %v604_v56, 2 }
 0x12f   :  { %v318_v11 = vshrl.u32 %v300_v6, %v316_v7  ;;  %v321_v17 = vadd.s32 127, %v320_v8  ;;  %v208_v18 = vclz %v836_v9 }
 0x130   :  { %vm239_vm12 = vcmp.eq.s32.totalorder %v234_v58, 2 }
 0x131   :  { %v319_v20 = vor.u32 %v318_v11, %v317_v10  ;;  %v322_v21 = vshll.u32 %v321_v17, 23  ;;  %v837_v22 = vadd.s32 4294967294, %v208_v18 }
 0x133   :  { %v323_v23 = vor.u32 4788187, %v322_v21  ;;  %vm838_vm15 = vcmp.lt.s32.totalorder %v837_v22, 0  ;;  %v326_v25 = vcvt.s32.f32 %v319_v20 }
 0x134   :  { %v211_v26 = vsel %vm838_vm15, 0, %v837_v22  ;;  %vm235_vm15 = vcmp.lt.s32.totalorder %v234_v58, 2 }
 0x135   :  { %v324_v24 = vand.u32 2147483647, %v323_v23  ;;  %v212_v28 = vsub.s32 32, %v211_v26  ;;  %v216_v29 = vsub.s32 4294967266, %v211_v26  ;;  %v213_v16 = vshll.u32 %v204_v3, %v211_v26 }
 0x137   :  { %v327_v14 = vmul.f32 %v326_v25, %v324_v24  ;;  %v214_v30 = vshrl.u32 %v196_v27, %v212_v28  ;;  %v217_v33 = vadd.s32 127, %v216_v29 }
 0x139   :  { %v328_v35 = vxor.u32 2147483648, %v327_v14  ;;  %v215_v38 = vor.u32 %v214_v30, %v213_v16  ;;  %v218_v39 = vshll.u32 %v217_v33, 23 }
 0x13b   :  { %v329_v32 = vsel %vm246_vm0, %v328_v35, %v327_v14  ;;  %v219_v31 = vor.u32 4788187, %v218_v39  ;;  %v222_v37 = vcvt.s32.f32 %v215_v38  ;;  %vm236_vm0 = vcmp.eq.s32.totalorder %v234_v58, 0 }
 0x13c   :  { %v332_v40 = vsel %vm245_vm1, %v1120_v12, %v329_v32  ;;  %vm232_vm1 = vweird.f32 %v1124_v15 }
 0x13d   :  { %v220_v41 = vand.u32 2147483647, %v219_v31  ;;  %934 = vcosq.f32 %v332_v40 }
 0x13e   :  { %936 = vsinq.f32 %v332_v40 }
 0x13f   :  { %v223_v42 = vmul.f32 %v222_v37, %v220_v41 }
 0x141   :  { %v224_v45 = vxor.u32 2147483648, %v223_v42 }
 0x143   :  { %v225_v13 = vsel %vm142_vm2, %v224_v45, %v223_v42  ;;  %vm336_vm2 = vweird.f32 %v1120_v12 }
 0x144   :  { %v228_v48 = vsel %vm141_vm3, %v1124_v15, %v225_v13  ;;  %v858_v15 = vld [vmem:[%s1212_s5] ss:$0 sm:$0xff] }
 0x145   :  { %938 = vcosq.f32 %v228_v48 }
 0x146   :  { %940 = vsinq.f32 %v228_v48 }
 0x147   :  { %v935_v51 = vpop.eup %934 }
 0x148   :  { %v937_v52 = vpop.eup %936  ;;  %v344_v36 = vxor.u32 2147483648, %v935_v51 }
 0x149   :  { %v341_v57 = vxor.u32 2147483648, %v937_v52 }
 0x14a   :  { %v345_v59 = vsel %vm343_vm5, %v344_v36, %v937_v52  ;;  %v714_v0 = vsel %vm712_vm8, %v344_v36, %v937_v52 }
 0x14b   :  { %v342_v62 = vsel %vm340_vm11, %v935_v51, %v341_v57  ;;  %v711_v63 = vsel %vm709_vm7, %v935_v51, %v341_v57 }
 0x14c   :  { %v346_v6 = vsel %vm339_vm10, %v342_v62, %v345_v59  ;;  %v715_v7 = vsel %vm708_vm6, %v711_v63, %v714_v0 }
 0x14d   :  { %v347_v17 = vsel %vm336_vm2, nan, %v346_v6  ;;  %v716_v18 = vsel %vm336_vm2, nan, %v715_v7 }
 0x14f   :  { %v939_v19 = vpop.eup %938 }
 0x150   :  { %v941_v60 = vpop.eup %940  ;;  %v240_v61 = vxor.u32 2147483648, %v939_v19 }
 0x151   :  { %v237_v1 = vxor.u32 2147483648, %v941_v60 }
 0x152   :  { %v241_v2 = vsel %vm239_vm12, %v240_v61, %v941_v60  ;;  %v611_v3 = vsel %vm609_vm14, %v240_v61, %v941_v60 }
 0x153   :  { %v238_v4 = vsel %vm236_vm0, %v939_v19, %v237_v1  ;;  %v608_v5 = vsel %vm606_vm13, %v939_v19, %v237_v1 }
 0x154   :  { %v242_v8 = vsel %vm235_vm15, %v238_v4, %v241_v2  ;;  %v612_v9 = vsel %vm605_vm9, %v608_v5, %v611_v3 }
 0x155   :  { %v243_v10 = vsel %vm232_vm1, nan, %v242_v8  ;;  %v613_v11 = vsel %vm232_vm1, nan, %v612_v9 }
 0x156   :  { %886 = vmatprep.mubr.msk.f32.mxu0 %vm351_vm4, %v243_v10  ;;  %900 = vmatprep.mubr.msk.f32.mxu1 %vm351_vm4, %v613_v11 }
 0x157   :  { %887 = vmatmul.mubr.msk.f32.vlgmr.msra.gmra.mrb[2].mxu0 %vm351_vm4, %v347_v17  ;;  %901 = vmatmul.mubr.msk.f32.vlgmr.msra.gmra.mrb[0].mxu1 %vm351_vm4, %v716_v18 }
 0x22a   :  { %v888_v20 = vpop.f32.mrb[2].mxu0  ;;  %v902_v21 = vpop.f32.mrb[0].mxu1 }
 0x22b   :  { %v911_v22 = vadd.f32 %v902_v21, %v888_v20  ;;  %v424_v23 = vpop.f32.mrb[3].mxu0  ;;  %v792_v24 = vpop.f32.mrb[1].mxu1 }
 0x22c   :  { %v912_v12 = vadd.f32 %v792_v24, %v424_v23 }
 0x22d   :  { %v811_v25 = vadd.f32 %v911_v22, %v858_v15 }
 0x22e   :  { %v810_v26 = vadd.f32 %v912_v12, %v858_v15 }
 0x22f   :  { %813 = vst [vmem:[#allocation7 + $0x8] sm:$0xff] %v811_v25 }
 0x230   :  { %812 = vst [vmem:[#allocation7] sm:$0xff] %v810_v26 }
 0x231   :  { %997 = shalt.err (!%p994_p6)
}
 0x232   :  { %s998_s12 = scalar_lea.hbm %s1213_s6, 256 }
 0x233   :  { %p999_p7 = scmp.ne.s32.totalorder %s1213_s6, %s998_s12  ;;  %p1002_p8 = scmp.lt.u32.totalorder %s998_s12, %s1213_s6 }
 0x235   :  { %p1004_p9 = pnand %p1002_p8, %p999_p7 }
 0x237   :  { %1007 = shalt.err (!%p1004_p9)
}
 0x238   :  { %825 = dma.vmem_to_hbm [thread:$0]  %s820_s9, 256, %s1213_s6, [#allocation4], %s1016_s2, %s1016_s2, %s1017_s19  }
 0x239   :  { %1012 = dma.done.wait [#allocation4], 256  }
 0x23a   :  { %1013 = vsyncadd [#allocation4], 4294967040 }
 0x23b   :  { %829 = vsyncpa [#allocation3], 1 }
 0x23c   :  { %830 = vsyncpa [#allocation6], 1 }
 0x23d   :  { %831 = vsyncpa [#allocation4], 1 }

</bundles_post_ra>
